<compile_context>
chip_gen: v7x
topology: tpu7x:2x2x1
jax: 0.10.0
libtpu: 0.0.40
codegen_flags: <defaults>
</compile_context>

<pallas_src>
import jax
import jax.numpy as jnp
from jax.experimental import pallas as pl
from jax.experimental.pallas import tpu as pltpu

# Problem constants (from the module definition).
K = 2                      # x1 second dim (linear in-features after permute)
M = 2                      # x1 third dim (rows of v1)
N = 2                      # linear out features
VOCAB, D = 4, 2            # embedding table
S = 4                      # indices per problem; [:, 2:, :] keeps S_TAIL rows
S_TAIL = S - 2
PAD_IDX = 1

TILE = 128                          # problems per grid step (lane axis)
IN_ROWS = K * M + S_TAIL            # 6 slab rows per problem
OUT_ROWS = M * N + S_TAIL * D       # 8 output rows per problem
_W_OFF, _B_OFF, _E_OFF = 0, N * K, N * K + N   # offsets into the SMEM params


def _fused_kernel(params_ref, slab_ref, out_ref):
    """One grid step = TILE problems laid out along the lane axis.

    params_ref: (14,) f32 SMEM = [W row-major (n,k) | b | E row-major (v,d)]
    slab_ref:   (6, TILE) f32 VMEM; row k*M+m holds x[k, m], row 4+i holds
                float(ids[i]) (small ints are exact in f32).
    out_ref:    (8, TILE) f32 VMEM; row m*N+n holds v2[m, n], row 4+i*D+d
                holds v3[i, d].
    """
    s = slab_ref[...]                                    # (6, TILE)
    width = s.shape[1]
    rows = []

    # ---- fused permute + linear, unrolled on the VPU -----------------------
    # v2[m, n] = sum_k x[k, m] * W[n, k] + b[n]
    for m in range(M):
        for n in range(N):
            acc = jnp.full((1, width), params_ref[_B_OFF + n], dtype=jnp.float32)
            for k in range(K):
                acc = acc + params_ref[_W_OFF + n * K + k] * s[k * M + m:k * M + m + 1, :]
            rows.append(acc)

    # ---- embedding gather via compare-and-select (index-safe) --------------
    for i in range(S_TAIL):
        idx = s[K * M + i:K * M + i + 1, :]              # (1, TILE) float indices
        acc = [jnp.zeros((1, width), jnp.float32) for _ in range(D)]
        for v in range(VOCAB):
            hit = idx == v
            for d in range(D):
                acc[d] = jnp.where(hit, params_ref[_E_OFF + v * D + d], acc[d])
        rows.extend(acc)

    out_ref[...] = jnp.concatenate(rows, axis=0)         # one unmasked (8, TILE) store


def _reference(x1, y1, w, b, emb_table):
    v1 = jnp.transpose(x1, (0, 2, 1))
    v2 = v1 @ w.T + b
    v3 = emb_table[y1][:, 2:, :]
    return v2, v3


def _batched_pallas(x1, y1, w, b, emb_table):
    bsz = x1.shape[0]

    # Lane-dense packing (problems along the last axis); pure layout ops that
    # XLA fuses around the custom call.
    x_rows = x1.reshape(bsz, K * M).T                    # (4, B), row k*M+m = x[k, m]
    id_rows = y1[:, 2:].astype(jnp.float32).T            # (2, B), small ints exact in f32
    slab = jnp.concatenate([x_rows, id_rows], axis=0)    # (6, B): single VMEM input
    p_pad = pl.cdiv(bsz, TILE) * TILE
    if p_pad != bsz:
        slab = jnp.pad(slab, ((0, 0), (0, p_pad - bsz)))  # padded ids = 0 (valid row)

    params = jnp.concatenate(
        [w.reshape(-1), b.reshape(-1), emb_table.reshape(-1)])   # (14,) shared scalars

    out = pl.pallas_call(
        _fused_kernel,
        out_shape=jax.ShapeDtypeStruct((OUT_ROWS, p_pad), jnp.float32),
        grid=(p_pad // TILE,),
        in_specs=[
            pl.BlockSpec(memory_space=pltpu.MemorySpace.SMEM),    # shared scalar params
            pl.BlockSpec((IN_ROWS, TILE), lambda i: (0, i)),      # per-problem slab
        ],
        out_specs=pl.BlockSpec((OUT_ROWS, TILE), lambda i: (0, i)),
        compiler_params=pltpu.CompilerParams(
            dimension_semantics=("parallel",)),                   # v7x: shard over 2 TCs
    )(params, slab)

    out = out[:, :bsz]                                   # drop lane padding
    v2 = out[:M * N].T.reshape(bsz, M, N)
    v3 = out[M * N:].T.reshape(bsz, S_TAIL, D)
    return v2, v3


@jax.jit
def model_forward(x1, y1, w, b, emb_table):
    if x1.shape[0] == 1:
        # Unbatched path: a custom-call launch + DMAs costs more than the
        # fully fused XLA expression for 16 bytes of output.
        return _reference(x1, y1, w, b, emb_table)
    return _batched_pallas(x1, y1, w, b, emb_table)


if __name__ == "__main__":
    key = jax.random.PRNGKey(0)
    kx, kw, kb, ke, ky = jax.random.split(key, 5)

    # Stack many small problems along the module's leading batch dim so one
    # pallas_call amortizes the launch cost (500 pads to 512 lanes -> grid=(4,)).
    BATCH = 500
    x1 = jax.random.normal(kx, (BATCH, K, M), dtype=jnp.float32)
    y1 = jax.random.randint(ky, (BATCH, S), 0, VOCAB, dtype=jnp.int32)

    w = jax.random.normal(kw, (N, K), dtype=jnp.float32) * 0.5        # Linear(2, 2).weight
    bias = jax.random.normal(kb, (N,), dtype=jnp.float32) * 0.1       # Linear(2, 2).bias
    emb_table = jax.random.normal(ke, (VOCAB, D), dtype=jnp.float32)
    emb_table = emb_table.at[PAD_IDX].set(0.0)                        # padding_idx=1 -> zero row

    v2, v3 = model_forward(x1, y1, w, bias, emb_table)
    jax.block_until_ready((v2, v3))

    r2, r3 = _reference(x1, y1, w, bias, emb_table)
    assert v2.shape == (BATCH, M, N) and v3.shape == (BATCH, S - 2, D)
    assert jnp.allclose(v2, r2, atol=1e-5), "linear mismatch"
    assert jnp.allclose(v3, r3, atol=1e-5), "embedding mismatch"

    print("KERNEL_OK")
</pallas_src>

<mosaic_0001>
module attributes {stable_mosaic.version = 11 : i64} {
  func.func @_fused_kernel(%arg0: i32, %arg1: memref<14xf32, #tpu.memory_space<smem>>, %arg2: memref<6x128xf32, #tpu.memory_space<vmem>>, %arg3: memref<8x128xf32, #tpu.memory_space<vmem>>) attributes {dimension_semantics = [#tpu.dimension_semantics<parallel>], iteration_bounds = array<i64: 4>, scalar_prefetch = 0 : i64, scratch_operands = 0 : i64, tpu.core_type = #tpu.core_type<tc>, window_params = [{transform_indices = @transform_0, window_bounds = array<i64: 14>}, {transform_indices = @transform_1, window_bounds = array<i64: 6, 128>}, {transform_indices = @transform_2, window_bounds = array<i64: 8, 128>}]} {
    %c0 = arith.constant 0 : index
    %c0_0 = arith.constant 0 : index
    %0 = vector.load %arg2[%c0, %c0_0] : memref<6x128xf32, #tpu.memory_space<vmem>>, vector<6x128xf32>
    %c4 = arith.constant 4 : index
    %1 = memref.load %arg1[%c4] : memref<14xf32, #tpu.memory_space<smem>>
    %2 = vector.broadcast %1 : f32 to vector<1x128xf32>
    %c0_1 = arith.constant 0 : index
    %3 = memref.load %arg1[%c0_1] : memref<14xf32, #tpu.memory_space<smem>>
    %4 = vector.extract_strided_slice %0 {offsets = [0, 0], sizes = [1, 128], strides = [1, 1]} : vector<6x128xf32> to vector<1x128xf32>
    %5 = vector.broadcast %3 : f32 to vector<1x128xf32>
    %6 = arith.mulf %5, %4 : vector<1x128xf32>
    %7 = arith.addf %2, %6 : vector<1x128xf32>
    %c1 = arith.constant 1 : index
    %8 = memref.load %arg1[%c1] : memref<14xf32, #tpu.memory_space<smem>>
    %9 = vector.extract_strided_slice %0 {offsets = [2, 0], sizes = [1, 128], strides = [1, 1]} : vector<6x128xf32> to vector<1x128xf32>
    %10 = vector.broadcast %8 : f32 to vector<1x128xf32>
    %11 = arith.mulf %10, %9 : vector<1x128xf32>
    %12 = arith.addf %7, %11 : vector<1x128xf32>
    %c5 = arith.constant 5 : index
    %13 = memref.load %arg1[%c5] : memref<14xf32, #tpu.memory_space<smem>>
    %14 = vector.broadcast %13 : f32 to vector<1x128xf32>
    %c2 = arith.constant 2 : index
    %15 = memref.load %arg1[%c2] : memref<14xf32, #tpu.memory_space<smem>>
    %16 = vector.extract_strided_slice %0 {offsets = [0, 0], sizes = [1, 128], strides = [1, 1]} : vector<6x128xf32> to vector<1x128xf32>
    %17 = vector.broadcast %15 : f32 to vector<1x128xf32>
    %18 = arith.mulf %17, %16 : vector<1x128xf32>
    %19 = arith.addf %14, %18 : vector<1x128xf32>
    %c3 = arith.constant 3 : index
    %20 = memref.load %arg1[%c3] : memref<14xf32, #tpu.memory_space<smem>>
    %21 = vector.extract_strided_slice %0 {offsets = [2, 0], sizes = [1, 128], strides = [1, 1]} : vector<6x128xf32> to vector<1x128xf32>
    %22 = vector.broadcast %20 : f32 to vector<1x128xf32>
    %23 = arith.mulf %22, %21 : vector<1x128xf32>
    %24 = arith.addf %19, %23 : vector<1x128xf32>
    %c4_2 = arith.constant 4 : index
    %25 = memref.load %arg1[%c4_2] : memref<14xf32, #tpu.memory_space<smem>>
    %26 = vector.broadcast %25 : f32 to vector<1x128xf32>
    %c0_3 = arith.constant 0 : index
    %27 = memref.load %arg1[%c0_3] : memref<14xf32, #tpu.memory_space<smem>>
    %28 = vector.extract_strided_slice %0 {offsets = [1, 0], sizes = [1, 128], strides = [1, 1]} : vector<6x128xf32> to vector<1x128xf32>
    %29 = vector.broadcast %27 : f32 to vector<1x128xf32>
    %30 = arith.mulf %29, %28 : vector<1x128xf32>
    %31 = arith.addf %26, %30 : vector<1x128xf32>
    %c1_4 = arith.constant 1 : index
    %32 = memref.load %arg1[%c1_4] : memref<14xf32, #tpu.memory_space<smem>>
    %33 = vector.extract_strided_slice %0 {offsets = [3, 0], sizes = [1, 128], strides = [1, 1]} : vector<6x128xf32> to vector<1x128xf32>
    %34 = vector.broadcast %32 : f32 to vector<1x128xf32>
    %35 = arith.mulf %34, %33 : vector<1x128xf32>
    %36 = arith.addf %31, %35 : vector<1x128xf32>
    %c5_5 = arith.constant 5 : index
    %37 = memref.load %arg1[%c5_5] : memref<14xf32, #tpu.memory_space<smem>>
    %38 = vector.broadcast %37 : f32 to vector<1x128xf32>
    %c2_6 = arith.constant 2 : index
    %39 = memref.load %arg1[%c2_6] : memref<14xf32, #tpu.memory_space<smem>>
    %40 = vector.extract_strided_slice %0 {offsets = [1, 0], sizes = [1, 128], strides = [1, 1]} : vector<6x128xf32> to vector<1x128xf32>
    %41 = vector.broadcast %39 : f32 to vector<1x128xf32>
    %42 = arith.mulf %41, %40 : vector<1x128xf32>
    %43 = arith.addf %38, %42 : vector<1x128xf32>
    %c3_7 = arith.constant 3 : index
    %44 = memref.load %arg1[%c3_7] : memref<14xf32, #tpu.memory_space<smem>>
    %45 = vector.extract_strided_slice %0 {offsets = [3, 0], sizes = [1, 128], strides = [1, 1]} : vector<6x128xf32> to vector<1x128xf32>
    %46 = vector.broadcast %44 : f32 to vector<1x128xf32>
    %47 = arith.mulf %46, %45 : vector<1x128xf32>
    %48 = arith.addf %43, %47 : vector<1x128xf32>
    %49 = vector.extract_strided_slice %0 {offsets = [4, 0], sizes = [1, 128], strides = [1, 1]} : vector<6x128xf32> to vector<1x128xf32>
    %cst = arith.constant 0.000000e+00 : f32
    %50 = vector.broadcast %cst : f32 to vector<1x128xf32>
    %cst_8 = arith.constant 0.000000e+00 : f32
    %51 = vector.broadcast %cst_8 : f32 to vector<1x128xf32>
    %cst_9 = arith.constant 0.000000e+00 : f32
    %52 = vector.broadcast %cst_9 : f32 to vector<1x128xf32>
    %53 = arith.cmpf oeq, %49, %52 : vector<1x128xf32>
    %c6 = arith.constant 6 : index
    %54 = memref.load %arg1[%c6] : memref<14xf32, #tpu.memory_space<smem>>
    %55 = vector.broadcast %54 : f32 to vector<1x128xf32>
    %56 = arith.select %53, %55, %50 : vector<1x128xi1>, vector<1x128xf32>
    %c7 = arith.constant 7 : index
    %57 = memref.load %arg1[%c7] : memref<14xf32, #tpu.memory_space<smem>>
    %58 = vector.broadcast %57 : f32 to vector<1x128xf32>
    %59 = arith.select %53, %58, %51 : vector<1x128xi1>, vector<1x128xf32>
    %cst_10 = arith.constant 1.000000e+00 : f32
    %60 = vector.broadcast %cst_10 : f32 to vector<1x128xf32>
    %61 = arith.cmpf oeq, %49, %60 : vector<1x128xf32>
    %c8 = arith.constant 8 : index
    %62 = memref.load %arg1[%c8] : memref<14xf32, #tpu.memory_space<smem>>
    %63 = vector.broadcast %62 : f32 to vector<1x128xf32>
    %64 = arith.select %61, %63, %56 : vector<1x128xi1>, vector<1x128xf32>
    %c9 = arith.constant 9 : index
    %65 = memref.load %arg1[%c9] : memref<14xf32, #tpu.memory_space<smem>>
    %66 = vector.broadcast %65 : f32 to vector<1x128xf32>
    %67 = arith.select %61, %66, %59 : vector<1x128xi1>, vector<1x128xf32>
    %cst_11 = arith.constant 2.000000e+00 : f32
    %68 = vector.broadcast %cst_11 : f32 to vector<1x128xf32>
    %69 = arith.cmpf oeq, %49, %68 : vector<1x128xf32>
    %c10 = arith.constant 10 : index
    %70 = memref.load %arg1[%c10] : memref<14xf32, #tpu.memory_space<smem>>
    %71 = vector.broadcast %70 : f32 to vector<1x128xf32>
    %72 = arith.select %69, %71, %64 : vector<1x128xi1>, vector<1x128xf32>
    %c11 = arith.constant 11 : index
    %73 = memref.load %arg1[%c11] : memref<14xf32, #tpu.memory_space<smem>>
    %74 = vector.broadcast %73 : f32 to vector<1x128xf32>
    %75 = arith.select %69, %74, %67 : vector<1x128xi1>, vector<1x128xf32>
    %cst_12 = arith.constant 3.000000e+00 : f32
    %76 = vector.broadcast %cst_12 : f32 to vector<1x128xf32>
    %77 = arith.cmpf oeq, %49, %76 : vector<1x128xf32>
    %c12 = arith.constant 12 : index
    %78 = memref.load %arg1[%c12] : memref<14xf32, #tpu.memory_space<smem>>
    %79 = vector.broadcast %78 : f32 to vector<1x128xf32>
    %80 = arith.select %77, %79, %72 : vector<1x128xi1>, vector<1x128xf32>
    %c13 = arith.constant 13 : index
    %81 = memref.load %arg1[%c13] : memref<14xf32, #tpu.memory_space<smem>>
    %82 = vector.broadcast %81 : f32 to vector<1x128xf32>
    %83 = arith.select %77, %82, %75 : vector<1x128xi1>, vector<1x128xf32>
    %84 = vector.extract_strided_slice %0 {offsets = [5, 0], sizes = [1, 128], strides = [1, 1]} : vector<6x128xf32> to vector<1x128xf32>
    %cst_13 = arith.constant 0.000000e+00 : f32
    %85 = vector.broadcast %cst_13 : f32 to vector<1x128xf32>
    %cst_14 = arith.constant 0.000000e+00 : f32
    %86 = vector.broadcast %cst_14 : f32 to vector<1x128xf32>
    %cst_15 = arith.constant 0.000000e+00 : f32
    %87 = vector.broadcast %cst_15 : f32 to vector<1x128xf32>
    %88 = arith.cmpf oeq, %84, %87 : vector<1x128xf32>
    %c6_16 = arith.constant 6 : index
    %89 = memref.load %arg1[%c6_16] : memref<14xf32, #tpu.memory_space<smem>>
    %90 = vector.broadcast %89 : f32 to vector<1x128xf32>
    %91 = arith.select %88, %90, %85 : vector<1x128xi1>, vector<1x128xf32>
    %c7_17 = arith.constant 7 : index
    %92 = memref.load %arg1[%c7_17] : memref<14xf32, #tpu.memory_space<smem>>
    %93 = vector.broadcast %92 : f32 to vector<1x128xf32>
    %94 = arith.select %88, %93, %86 : vector<1x128xi1>, vector<1x128xf32>
    %cst_18 = arith.constant 1.000000e+00 : f32
    %95 = vector.broadcast %cst_18 : f32 to vector<1x128xf32>
    %96 = arith.cmpf oeq, %84, %95 : vector<1x128xf32>
    %c8_19 = arith.constant 8 : index
    %97 = memref.load %arg1[%c8_19] : memref<14xf32, #tpu.memory_space<smem>>
    %98 = vector.broadcast %97 : f32 to vector<1x128xf32>
    %99 = arith.select %96, %98, %91 : vector<1x128xi1>, vector<1x128xf32>
    %c9_20 = arith.constant 9 : index
    %100 = memref.load %arg1[%c9_20] : memref<14xf32, #tpu.memory_space<smem>>
    %101 = vector.broadcast %100 : f32 to vector<1x128xf32>
    %102 = arith.select %96, %101, %94 : vector<1x128xi1>, vector<1x128xf32>
    %cst_21 = arith.constant 2.000000e+00 : f32
    %103 = vector.broadcast %cst_21 : f32 to vector<1x128xf32>
    %104 = arith.cmpf oeq, %84, %103 : vector<1x128xf32>
    %c10_22 = arith.constant 10 : index
    %105 = memref.load %arg1[%c10_22] : memref<14xf32, #tpu.memory_space<smem>>
    %106 = vector.broadcast %105 : f32 to vector<1x128xf32>
    %107 = arith.select %104, %106, %99 : vector<1x128xi1>, vector<1x128xf32>
    %c11_23 = arith.constant 11 : index
    %108 = memref.load %arg1[%c11_23] : memref<14xf32, #tpu.memory_space<smem>>
    %109 = vector.broadcast %108 : f32 to vector<1x128xf32>
    %110 = arith.select %104, %109, %102 : vector<1x128xi1>, vector<1x128xf32>
    %cst_24 = arith.constant 3.000000e+00 : f32
    %111 = vector.broadcast %cst_24 : f32 to vector<1x128xf32>
    %112 = arith.cmpf oeq, %84, %111 : vector<1x128xf32>
    %c12_25 = arith.constant 12 : index
    %113 = memref.load %arg1[%c12_25] : memref<14xf32, #tpu.memory_space<smem>>
    %114 = vector.broadcast %113 : f32 to vector<1x128xf32>
    %115 = arith.select %112, %114, %107 : vector<1x128xi1>, vector<1x128xf32>
    %c13_26 = arith.constant 13 : index
    %116 = memref.load %arg1[%c13_26] : memref<14xf32, #tpu.memory_space<smem>>
    %117 = vector.broadcast %116 : f32 to vector<1x128xf32>
    %118 = arith.select %112, %117, %110 : vector<1x128xi1>, vector<1x128xf32>
    %119 = tpu.concatenate %12, %24, %36, %48, %80, %83, %115, %118 in 0 : vector<1x128xf32>, vector<1x128xf32>, vector<1x128xf32>, vector<1x128xf32>, vector<1x128xf32>, vector<1x128xf32>, vector<1x128xf32>, vector<1x128xf32> -> vector<8x128xf32>
    %c0_27 = arith.constant 0 : index
    %c0_28 = arith.constant 0 : index
    %120 = vector.load %arg3[%c0_27, %c0_28] : memref<8x128xf32, #tpu.memory_space<vmem>>, vector<8x128xf32>
    tpu.vector_store %arg3[%c0_27, %c0_28], %119 {strides = array<i32>} : memref<8x128xf32, #tpu.memory_space<vmem>>, vector<8x128xf32>,
    return
  }
  func.func @transform_0(%arg0: i32) -> i32 {
    %c0_i32 = arith.constant 0 : i32
    %c0_i32_0 = arith.constant 0 : i32
    return %c0_i32 : i32
  }
  func.func @transform_1(%arg0: i32) -> (i32, i32) {
    %c0_i32 = arith.constant 0 : i32
    %c0_i32_0 = arith.constant 0 : i32
    return %c0_i32, %arg0 : i32, i32
  }
  func.func @transform_2(%arg0: i32) -> (i32, i32) {
    %c0_i32 = arith.constant 0 : i32
    %c0_i32_0 = arith.constant 0 : i32
    return %c0_i32, %arg0 : i32, i32
  }
}

</mosaic_0001>

<bundles_post_ra>
// kernel: model_forward.1
= control target key start
LH: loop header
LB: loop body
LE: loop exit
PB: predicated region body
PF: predicated region fallthrough
CT: control target
= control target key end

     0   :  { %7 = vsyncpa [#allocation3], 0  ;;  %s390_s9 = smov 0   ;;  %s452_s0 = inlined_call_operand.vmem [shape: f32[14], index: 0, kind: input, shape index: {}]   ;;  %s453_s1 = inlined_call_operand.vmem [shape: f32[6,512], index: 1, kind: input, shape index: {}]   ;;  %s454_s2 = inlined_call_operand.vmem [shape: f32[8,512], index: 2, kind: output, shape index: {}]  }
   0x1 LB: > { %s304_s10 = sadd.s32 4294967295, %s372_s9   ;;  %p306_p0 = scmp.ge.s32.totalorder %s372_s9, 1  ;;  %s372_s9 = sphi %s390_s9, %s13_s9  }
   0x2   : > { %p91_p1 = scmp.lt.s32.totalorder %s372_s9, 5  ;;  %s104_s13 = sshll.u32 %s452_s0, 4  ;;  %s105_s13 = int_to_ptr.vmem [resolvable:$true] %s104_s13 }
   0x3   : > { %p336_p3 = scmp.eq.s32.totalorder %s304_s10, 0  ;;  %s347_s15 = scalar_lea.vmem %s105_s13, 16 }
   0x4   : > { %p401_p2 = pnand %p306_p0, %p91_p1  ;;  %p348_p6 = scmp.ne.s32.totalorder %s105_s13, %s347_s15 }
   0x5   : > { %p355_p10 = scmp.lt.s32.totalorder %s105_s13, %s105_s13  ;;  %p356_p11 = scmp.lt.s32.totalorder %s347_s15, %s347_s15 }
   0x6   : > { %p332_p4 = pneg %p401_p2 }
   0x7   : > { %p357_p12 = por %p356_p11, %p355_p10 }
   0x8   : > { %p333_p5 = pnand %p336_p3, %p332_p4 }
   0xa   : > { %p349_p7 = pneg %p333_p5 }
   0xc   : > { %p350_p8 = pnand %p349_p7, %p348_p6 }
   0xe   : > { %p351_p9 = pneg %p350_p8 }
  0x10   : > { %p358_p13 = pnand %p357_p12, %p351_p9 }
  0x12   : > { %361 = shalt.err (!%p358_p13)
}
  0x13   : > { %s374_s16 = smov [#allocation2]   ;;  %124 = sbr.rel (%p401_p2) target bundleno = 56 (0x38), region = 28 }
  0x14   : > { %335 = dma.vmem_to_smem (!%p333_p5), %s105_s13, 16, %s374_s16, [#allocation3]  }
  0x1a   : > { %367 = dma.done.wait (%p336_p3), [#allocation3], 16  }
  0x1b   : > { %369 = vsyncadd (%p336_p3), [#allocation3], 4294967280 }
  0x1c   : > { %130 = sfence }
  0x1d   : > { %p145_p0 = scmp.lt.s32.totalorder %s304_s10, 3  ;;  %s313_s17 = sld [smem:[#allocation2 + $0x4]]  ;;  %vm224_vm1 = vcmask 1040384   ;;  %vm226_vm5 = vcmask 1041408   ;;  %vm228_vm6 = vcmask 1042432   ;;  %vm230_vm7 = vcmask 1043456  }
  0x1e   : > { %s156_s18 = sld [smem:[#allocation2]]  ;;  %s314_s19 = sld [smem:[#allocation2 + $0x1]]  ;;  %vm232_vm8 = vcmask 1044480   ;;  %vm234_vm9 = vcmask 1045504   ;;  %vm236_vm10 = vcmask 1046528  }
  0x1f   : > { %s457_s10 = smov (!%p145_p0, %s304_s10), 3  ;;  %s414_s20 = sld [smem:[#allocation2 + $0x5]] }
  0x20   : > { %s316_s21 = sld [smem:[#allocation2 + $0x2]]  ;;  %s311_s22 = sshll.u32 %s457_s10, 3 }
  0x21   : > { %s317_s23 = sld [smem:[#allocation2 + $0x3]]  ;;  %s148_s26 = scalar_lea.vmem %s453_s1, %s311_s22 }
  0x22   : > { %v153_v0 = vld [vmem:[%s148_s26] sm:$0x3f]  ;;  %s318_s27 = sld [smem:[#allocation2 + $0x6]]  ;;  %s319_s28 = sld [smem:[#allocation2 + $0x7]] }
  0x23   : > { %v155_v1 = vstv %s313_s17  ;;  %s320_s29 = sld [smem:[#allocation2 + $0x8]]  ;;  %s422_s30 = sld [smem:[#allocation2 + $0x9]]  ;;  %vm180_vm0 = vcmp.eq.f32.partialorder %v153_v0, 0.0  ;;  %vm187_vm2 = vcmp.eq.f32.partialorder %v153_v0, 1.0  ;;  %vm194_vm3 = vcmp.eq.f32.partialorder %v153_v0, 2.0 }
  0x24   : > { %v157_v2 = vstv %s156_s18  ;;  %v161_v3 = vstv %s314_s19  ;;  %s322_s3 = sld [smem:[#allocation2 + $0xa]]  ;;  %s424_s4 = sld [smem:[#allocation2 + $0xb]]  ;;  %vm201_vm4 = vcmp.eq.f32.partialorder %v153_v0, 3.0 }
  0x25   : > { %v158_v4 = vmul.f32 %v157_v2, %v153_v0  ;;  %v162_v5 = vmul.f32 %v161_v3, %v153_v0  ;;  %v168_v6 = vstv %s414_s20  ;;  %s427_s5 = sld [smem:[#allocation2 + $0xc]]  ;;  %s429_s6 = sld [smem:[#allocation2 + $0xd]] }
  0x26   : > { %v170_v7 = vstv %s316_s21  ;;  %s152_s11 = scalar_lea.vmem %s454_s2, %s311_s22 }
  0x27   : > { %v159_v8 = vadd.f32 %v158_v4, %v155_v1  ;;  %v164_v9 = vrot.slane %v162_v5, 2  ;;  %v171_v10 = vmul.f32 %v170_v7, %v153_v0  ;;  %v174_v11 = vstv %s317_s23 }
  0x28   : > { %v175_v12 = vmul.f32 %v174_v11, %v153_v0  ;;  %v182_v15 = vstv %s318_s27  ;;  %v185_v16 = vstv %s319_s28 }
  0x29   : > { %v166_v13 = vadd.f32 %v164_v9, %v159_v8  ;;  %v172_v14 = vadd.f32 %v171_v10, %v168_v6  ;;  %v183_v18 = vsel %vm180_vm0, %v182_v15, 0.0  ;;  %v186_v19 = vsel %vm180_vm0, %v185_v16, 0.0 }
  0x2a   : > { %v177_v17 = vrot.slane %v175_v12, 2  ;;  %v189_v20 = vstv %s320_s29  ;;  %v192_v22 = vstv %s422_s30  ;;  %v196_v23 = vstv %s322_s3 }
  0x2b   : > { %v190_v21 = vsel %vm187_vm2, %v189_v20, %v183_v18  ;;  %v199_v24 = vstv %s424_s4  ;;  %v193_v26 = vsel %vm187_vm2, %v192_v22, %v186_v19  ;;  %v203_v28 = vstv %s427_s5 }
  0x2c   : > { %v179_v25 = vadd.f32 %v177_v17, %v172_v14  ;;  %v197_v27 = vsel %vm194_vm3, %v196_v23, %v190_v21  ;;  %v200_v29 = vsel %vm194_vm3, %v199_v24, %v193_v26  ;;  %v206_v30 = vstv %s429_s6 }
  0x2d   : > { %v212_v31 = vrot.slane %v166_v13, 7  ;;  %v204_v32 = vsel %vm201_vm4, %v203_v28, %v197_v27  ;;  %v207_v33 = vsel %vm201_vm4, %v206_v30, %v200_v29 }
  0x2e   : > { %v209_v34 = vrot.slane %v179_v25, 7  ;;  %v214_v35 = vrot.slane %v179_v25, 6  ;;  %v217_v36 = vrot.slane %v207_v33, 7  ;;  %v220_v38 = vrot.slane %v204_v32, 7 }
  0x2f   : > { %v222_v40 = vrot.slane %v207_v33, 6 }
  0x30   : > { %v225_v37 = vsel %vm224_vm1, %v166_v13, %v209_v34 }
  0x31   : > { %v227_v39 = vsel %vm226_vm5, %v225_v37, %v212_v31 }
  0x32   : > { %v229_v41 = vsel %vm228_vm6, %v227_v39, %v214_v35 }
  0x33   : > { %v231_v42 = vsel %vm230_vm7, %v229_v41, %v204_v32 }
  0x34   : > { %v233_v43 = vsel %vm232_vm8, %v231_v42, %v217_v36 }
  0x35   : > { %v235_v44 = vsel %vm234_vm9, %v233_v43, %v220_v38 }
  0x36   : > { %v237_v45 = vsel %vm236_vm10, %v235_v44, %v222_v40 }
  0x37   : > { %238 = vst [vmem:[%s152_s11] sm:$0xff] %v237_v45 }
  0x38 PF: > { %s13_s9 = sadd.s32 1, %s372_s9  }
  0x39   : > { %p10_p1 = scmp.ge.s32.totalorder %s13_s9, 6  }
  0x3b   :  { %12 = sbr.rel (!%p10_p1) target bundleno = 1 (0x1), region = 63 }
  0x42   :  { %258 = vsyncpa [#allocation3], 1 }
  0x43   :  { %260 = vsyncpa [#allocation3 + $0x1], 1 }

</bundles_post_ra>
